<compile_context>
chip_gen: v7x
topology: tpu7x:2x2x1
jax: 0.10.0
libtpu: 0.0.40
codegen_flags: <defaults>
</compile_context>

<pallas_src>
import functools

import jax
import jax.numpy as jnp
from jax.experimental import pallas as pl
from jax.experimental.pallas import tpu as pltpu


# ----------------------------------------------------------------------------
# Kernel
# ----------------------------------------------------------------------------
def _lora_kernel(x_ref, wa_ref, wb_ref, o_ref, *, scaling, residual_in_f32):
    # x_ref:  (TM, D) tile of the flattened activations (native dtype)
    # wa_ref: (D, r)  lora_a.weight.T   (VMEM-resident across the grid)
    # wb_ref: (r, D)  lora_b.weight.T   (VMEM-resident across the grid)
    x = x_ref[...]
    # MXU takes native (f32/bf16) operands; accumulate in f32.
    t = jnp.dot(x, wa_ref[...], preferred_element_type=jnp.float32)        # (TM, r) f32
    # alpha/r applied in f32 on the tiny (TM, r) intermediate (cheap + precise).
    t = t * scaling
    lora = jnp.dot(t.astype(wb_ref.dtype), wb_ref[...],
                   preferred_element_type=jnp.float32)                      # (TM, D) f32
    if residual_in_f32:
        # f32 residual add (f32 inputs, and bf16 on v5e where bf16 VPU is emulated).
        o_ref[...] = (x.astype(jnp.float32) + lora).astype(o_ref.dtype)
    else:
        # Native-dtype residual add (bf16 on v6e/v7x): no (TM, D) f32 upcast temp.
        o_ref[...] = x + lora.astype(x.dtype)


# ----------------------------------------------------------------------------
# Hardware queries / tile sizing
# ----------------------------------------------------------------------------
def _vmem_capacity_bytes():
    """Physical VMEM per TensorCore; conservative 64 MiB fallback (v7x-safe)."""
    try:
        info = pltpu.get_tpu_info()
        cap = getattr(info, "vmem_capacity_bytes", None)
        if cap:
            return int(cap)
    except Exception:
        pass
    return 64 << 20


def _is_v5e():
    try:
        kind = jax.devices()[0].device_kind.lower()
        return ("v5 lite" in kind) or ("v5e" in kind) or ("v5litepod" in kind)
    except Exception:
        return False


def _choose_tile_m(M, D, itemsize, sublane, budget_bytes, weight_bytes):
    """Largest sublane-aligned row tile whose working set fits the VMEM budget.

    Per-row working set:
      * double-buffered x input tile  : 2 * D * itemsize
      * double-buffered output tile   : 2 * D * itemsize
      * f32 intermediates (second-dot output + f32 residual/epilogue temp)
                                       : ~2 * D * 4
    plus the (double-buffered) resident weights, counted once off the top.
    """
    bytes_per_row = D * (4 * itemsize + 2 * 4)
    avail = budget_bytes - 2 * weight_bytes - (2 << 20)        # small headroom
    avail = max(avail, sublane * bytes_per_row)
    max_rows = max(sublane, avail // bytes_per_row)
    tile = min(M, max_rows)
    # Ensure >= 2 grid steps whenever possible so dimension_semantics=("parallel",)
    # can shard the grid across both v7x TensorCores (and avoid a straggler step).
    if M >= 2 * sublane:
        tile = min(tile, -(-M // 2))                           # cdiv(M, 2)
    tile = max(sublane, (tile // sublane) * sublane)
    return int(tile)


# ----------------------------------------------------------------------------
# Jitted forward (x is DONATED: callers must not read x afterwards)
# ----------------------------------------------------------------------------
@functools.partial(
    jax.jit,
    static_argnames=("scaling", "tile_m", "vmem_limit", "residual_in_f32"),
    donate_argnums=(0,),
)
def _lora_forward_jit(x, wa_t, wb_t, *, scaling, tile_m, vmem_limit, residual_in_f32):
    B, S, D = x.shape
    M = B * S
    r = wa_t.shape[1]
    x2d = x.reshape(M, D)                      # free under jit (metadata only)

    kernel = functools.partial(_lora_kernel, scaling=scaling,
                               residual_in_f32=residual_in_f32)
    grid = (pl.cdiv(M, tile_m),)

    out2d = pl.pallas_call(
        kernel,
        out_shape=jax.ShapeDtypeStruct((M, D), x.dtype),
        grid_spec=pltpu.PrefetchScalarGridSpec(
            num_scalar_prefetch=0,
            grid=grid,
            in_specs=[
                pl.BlockSpec((tile_m, D), lambda i: (i, 0)),   # x tile (streamed)
                pl.BlockSpec((D, r), lambda i: (0, 0)),        # Wa (resident)
                pl.BlockSpec((r, D), lambda i: (0, 0)),        # Wb (resident)
            ],
            out_specs=pl.BlockSpec((tile_m, D), lambda i: (i, 0)),
        ),
        # Residual output reuses x's (donated) HBM buffer: true in-place update.
        input_output_aliases={0: 0},
        compiler_params=pltpu.CompilerParams(
            dimension_semantics=("parallel",),
            vmem_limit_bytes=vmem_limit),
    )(x2d, wa_t, wb_t)

    return out2d.reshape(B, S, D)


def lora_forward(x, wa_t, wb_t, *, alpha, r, tile_m=None):
    """x: (batch, seq, hidden); wa_t: (hidden, r); wb_t: (r, hidden).

    NOTE: x is donated to the kernel (in-place residual); do not read x afterwards.
    """
    scaling = float(alpha) / float(r)
    B, S, D = x.shape
    M = B * S

    itemsize = jnp.dtype(x.dtype).itemsize
    sublane = max(8, 32 // itemsize)           # 8 (f32) / 16 (bf16) / 32 (int8/fp8)

    capacity = _vmem_capacity_bytes()
    budget = int(capacity * 0.72)              # ~92 MiB on 128 MiB parts, ~46 MiB on v7x

    wt_bytes = (wa_t.size * jnp.dtype(wa_t.dtype).itemsize
                + wb_t.size * jnp.dtype(wb_t.dtype).itemsize)

    if tile_m is None:
        tile_m = _choose_tile_m(M, D, itemsize, sublane, budget, wt_bytes)

    # Working set with f32 intermediates counted, + headroom, clamped below the
    # physical ceiling (leaves room for compiler scratch on v7x's 64 MiB).
    working_set = tile_m * D * (4 * itemsize + 2 * 4) + 2 * wt_bytes
    vmem_limit = int(min(max(working_set + (6 << 20), 16 << 20),
                         capacity - (8 << 20)))

    # bf16 residual epilogue only on chips with a bf16 VPU (v6e/v7x).
    is_bf16 = jnp.dtype(x.dtype) == jnp.dtype(jnp.bfloat16)
    residual_in_f32 = (not is_bf16) or _is_v5e()

    return _lora_forward_jit(x, wa_t, wb_t,
                             scaling=scaling,
                             tile_m=int(tile_m),
                             vmem_limit=int(vmem_limit),
                             residual_in_f32=bool(residual_in_f32))


# ----------------------------------------------------------------------------
# Reference
# ----------------------------------------------------------------------------
def lora_reference(x, wa_t, wb_t, *, alpha, r):
    scaling = float(alpha) / float(r)
    lora = jnp.einsum("bsd,dr,re->bse",
                      x.astype(jnp.float32),
                      wa_t.astype(jnp.float32),
                      wb_t.astype(jnp.float32))
    return (x.astype(jnp.float32) + lora * scaling).astype(x.dtype)


if __name__ == "__main__":
    # Small shapes consistent with the module: residual => in_features == out_features.
    batch, seq, hidden, r, alpha = 2, 8, 32, 4, 8
    dropout_p = 0.1  # nn.Dropout is identity at inference time

    key = jax.random.PRNGKey(0)
    kx, ka, kb = jax.random.split(key, 3)

    x = jax.random.normal(kx, (batch, seq, hidden), dtype=jnp.float32)
    # PyTorch stores Linear weight as (out, in); we build the transposed form directly.
    wa_t = jax.random.normal(ka, (hidden, r), dtype=jnp.float32) * 0.1   # lora_a.weight.T
    wb_t = jax.random.normal(kb, (r, hidden), dtype=jnp.float32) * 0.1   # lora_b.weight.T

    # Reference first: x is DONATED to the kernel (in-place residual update).
    y_ref = lora_reference(x, wa_t, wb_t, alpha=alpha, r=r)
    y_ref = jax.block_until_ready(y_ref)

    y = lora_forward(x, wa_t, wb_t, alpha=alpha, r=r)
    y = jax.block_until_ready(y)

    assert y.shape == (batch, seq, hidden) and y.dtype == y_ref.dtype
    assert jnp.allclose(y, y_ref, atol=1e-5, rtol=1e-5), "mismatch vs reference"

    print("KERNEL_OK")
</pallas_src>

<mosaic_0001>
module attributes {stable_mosaic.version = 11 : i64} {
  func.func @_lora_kernel(%arg0: i32, %arg1: memref<8x32xf32, #tpu.memory_space<vmem>>, %arg2: memref<32x4xf32, #tpu.memory_space<vmem>>, %arg3: memref<4x32xf32, #tpu.memory_space<vmem>>, %arg4: memref<8x32xf32, #tpu.memory_space<vmem>>) attributes {dimension_semantics = [#tpu.dimension_semantics<parallel>], iteration_bounds = array<i64: 2>, scalar_prefetch = 0 : i64, scratch_operands = 0 : i64, tpu.core_type = #tpu.core_type<tc>, window_params = [{transform_indices = @transform_0, window_bounds = array<i64: 8, 32>}, {pipeline_mode = #tpu.pipeline_mode<synchronous>, transform_indices = @transform_1, window_bounds = array<i64: 32, 4>}, {pipeline_mode = #tpu.pipeline_mode<synchronous>, transform_indices = @transform_2, window_bounds = array<i64: 4, 32>}, {transform_indices = @transform_3, window_bounds = array<i64: 8, 32>}]} {
    %c0 = arith.constant 0 : index
    %c0_0 = arith.constant 0 : index
    %0 = vector.load %arg1[%c0, %c0_0] : memref<8x32xf32, #tpu.memory_space<vmem>>, vector<8x32xf32>
    %c0_1 = arith.constant 0 : index
    %c0_2 = arith.constant 0 : index
    %1 = vector.load %arg2[%c0_1, %c0_2] : memref<32x4xf32, #tpu.memory_space<vmem>>, vector<32x4xf32>
    %cst = arith.constant dense<0.000000e+00> : vector<8x4xf32>
    %2 = tpu.matmul %0, %1, %cst {dimension_numbers = #tpu.dot_dimension_numbers<[1], [0], [0], [1], [0, 0, 1, 1], [], []>} : vector<8x32xf32>, vector<32x4xf32>, vector<8x4xf32> -> vector<8x4xf32>
    %cst_3 = arith.constant 2.000000e+00 : f32
    %3 = vector.broadcast %cst_3 : f32 to vector<8x4xf32>
    %4 = arith.mulf %2, %3 : vector<8x4xf32>
    %c0_4 = arith.constant 0 : index
    %c0_5 = arith.constant 0 : index
    %5 = vector.load %arg3[%c0_4, %c0_5] : memref<4x32xf32, #tpu.memory_space<vmem>>, vector<4x32xf32>
    %cst_6 = arith.constant dense<0.000000e+00> : vector<8x32xf32>
    %6 = tpu.matmul %4, %5, %cst_6 {dimension_numbers = #tpu.dot_dimension_numbers<[1], [0], [0], [1], [0, 0, 1, 1], [], []>} : vector<8x4xf32>, vector<4x32xf32>, vector<8x32xf32> -> vector<8x32xf32>
    %7 = arith.addf %0, %6 : vector<8x32xf32>
    %c0_7 = arith.constant 0 : index
    %c0_8 = arith.constant 0 : index
    %8 = vector.load %arg4[%c0_7, %c0_8] : memref<8x32xf32, #tpu.memory_space<vmem>>, vector<8x32xf32>
    tpu.vector_store %arg4[%c0_7, %c0_8], %7 {strides = array<i32>} : memref<8x32xf32, #tpu.memory_space<vmem>>, vector<8x32xf32>,
    return
  }
  func.func @transform_0(%arg0: i32) -> (i32, i32) {
    %c0_i32 = arith.constant 0 : i32
    %c0_i32_0 = arith.constant 0 : i32
    return %arg0, %c0_i32 : i32, i32
  }
  func.func @transform_1(%arg0: i32) -> (i32, i32) {
    %c0_i32 = arith.constant 0 : i32
    %c0_i32_0 = arith.constant 0 : i32
    %c0_i32_1 = arith.constant 0 : i32
    return %c0_i32, %c0_i32_0 : i32, i32
  }
  func.func @transform_2(%arg0: i32) -> (i32, i32) {
    %c0_i32 = arith.constant 0 : i32
    %c0_i32_0 = arith.constant 0 : i32
    %c0_i32_1 = arith.constant 0 : i32
    return %c0_i32, %c0_i32_0 : i32, i32
  }
  func.func @transform_3(%arg0: i32) -> (i32, i32) {
    %c0_i32 = arith.constant 0 : i32
    %c0_i32_0 = arith.constant 0 : i32
    return %arg0, %c0_i32 : i32, i32
  }
}

</mosaic_0001>

<bundles_post_ra>
// kernel: _lora_forward_jit.1
= control target key start
LH: loop header
LB: loop body
LE: loop exit
PB: predicated region body
PF: predicated region fallthrough
CT: control target
= control target key end

     0   :  { %s463_s12 = smov 0   ;;  %s495_s0 = inlined_call_operand.vmem [shape: f32[16,32], index: 0, kind: input, shape index: {}, may-alias: {0,3}]   ;;  %s496_s1 = inlined_call_operand.vmem [shape: f32[32,4], index: 1, kind: input, shape index: {}]   ;;  %s497_s2 = inlined_call_operand.vmem [shape: f32[4,32], index: 2, kind: input, shape index: {}]   ;;  %s498_s3 = inlined_call_operand.vmem [shape: f32[16,32], index: 3, kind: output, shape index: {}, may-alias: {0,3}]  }
   0x1 LB: > { %s380_s13 = sadd.s32 4294967295, %s438_s12   ;;  %p384_p0 = scmp.ge.s32.totalorder %s438_s12, 1  ;;  %s438_s12 = sphi %s463_s12, %s13_s12  }
   0x2   : > { %p136_p1 = scmp.lt.s32.totalorder %s438_s12, 3 }
   0x4   : > { %p137_p2 = pnand %p384_p0, %p136_p1 }
   0x5   : > { %v167_v0 = vld [vmem:[%s496_s1] sm:$0xff] (!%p137_p2)  ;;  %v168_v1 = vld [vmem:[%s496_s1 + $0x8] sm:$0xff] (!%p137_p2)  ;;  %v169_v2 = vld [vmem:[%s496_s1 + $0x10] sm:$0xff] (!%p137_p2)  ;;  %v440_v3 = vmov (!%p137_p2), 0.0|0.0   ;;  %vm441_vm0 = vmmov (!%p137_p2), 0   ;;  %v442_v6 = vmov (!%p137_p2), 0.0  }
   0x6   : > { %140 = sbr.rel (%p137_p2) target bundleno = 446 (0x1be), region = 32  ;;  %415 = vmatprep.subr.bf16.mxu0 (!%p137_p2), %v440_v3  ;;  %v416_v4 = vpack.c.bf16 (!%p137_p2), %v168_v1, %v167_v0  ;;  %v170_v5 = vld [vmem:[%s496_s1 + $0x18] sm:$0xff] (!%p137_p2)  ;;  %407 = vmatprep.mubr.msk.f32.mxu0 (!%p137_p2), %vm441_vm0, %v442_v6  ;;  %p158_p3 = scmp.lt.s32.totalorder (!%p137_p2), %s380_s13, 1  ;;  %vm171_vm1 = vcmask (!%p137_p2), 261120   ;;  %v246_v9 = vld [vmem:[%s497_s2] sm:$0xf] (!%p137_p2) }
   0x7   : > { %410 = vmatprep.subr.mxu1 (!%p137_p2), %v442_v6  ;;  %412 = vmatprep.mubr.msk.f32.mxu1 (!%p137_p2), %vm441_vm0, %v442_v6  ;;  %v419_v7 = vpack.c.bf16 (!%p137_p2), %v170_v5, %v169_v2  ;;  %vm251_vm2 = vcmask (!%p137_p2), 1043456   ;;  %vm247_vm3 = vcmask (!%p137_p2), 31744  }
   0x8   : > { %417 = vmatpush3.bf16.msra.mxu0 (!%p137_p2), %v416_v4  ;;  %411 = vmatpush3.msk.msra.mxu1 (!%p137_p2), %vm251_vm2, %v246_v9 }
   0x9   : > { %418 = vmatprep.subr.bf16.mxu0 (!%p137_p2), %v440_v3 }
   0xc   : > { %420 = vmatpush3.bf16.msra.mxu0 (!%p137_p2), %v419_v7 }
   0xd   : > { %s500_s13 = smov (!%p158_p3, %s380_s13), 1 }
   0xe   : > { %s385_s22 = sshll.u32 %s500_s13, 3 }
   0xf   : > { %s161_s25 = scalar_lea.vmem %s495_s0, %s385_s22  ;;  %s165_s30 = scalar_lea.vmem %s498_s3, %s385_s22 }
  0x10   : > { %v166_v8 = vld [vmem:[%s161_s25] sm:$0xff] }
  0x11   : > { %408 = vmatmul.mubr.msk.f32.vlgmr.msra.gmra.mrb[0].mxu0 %vm171_vm1, %v166_v8 }
  0xe4   : > { %v241_v10 = vpop.f32.mrb[0].mxu0 }
  0xe5   : > { %v245_v11 = vmul.f32 2.0, %v241_v10  ;;  %v409_v12 = vpop.f32.mrb[1].mxu0 }
  0xe7   : > { %413 = vmatmul.mubr.msk.f32.vlgmr.msra.gmra.mrb[0].mxu1 %vm247_vm3, %v245_v11 }
 0x1ba   : > { %v321_v13 = vpop.f32.mrb[0].mxu1 }
 0x1bb   : > { %v325_v14 = vadd.f32 %v321_v13, %v166_v8  ;;  %v414_v15 = vpop.f32.mrb[1].mxu1 }
 0x1bd   : > { %326 = vst.msk [vmem:[%s165_s30] sm:$0xff] %vm171_vm1, %v325_v14 }
 0x1be PF: > { %s13_s12 = sadd.s32 1, %s438_s12  }
 0x1bf   : > { %p10_p4 = scmp.ge.s32.totalorder %s13_s12, 4  }
 0x1c1   :  { %12 = sbr.rel (!%p10_p4) target bundleno = 1 (0x1), region = 62 }

</bundles_post_ra>
